<compile_context>
chip_gen: v6e
topology: v6e:2x2x1
jax: 0.10.0
libtpu: 0.0.40
codegen_flags: <defaults>
</compile_context>

<pallas_src>
import functools
import math

import jax
import jax.numpy as jnp
from jax.experimental import pallas as pl
from jax.experimental.pallas import tpu as pltpu

_VMEM_LIMIT = 48 * 1024 * 1024  # under v7x's 64 MiB physical VMEM, above the 16/32 MiB defaults


# --------------------------- kernel 1: QKV projection + RoPE ---------------------------
def qkv_rope_kernel(x_ref, cos_ref, sin_ref, wq_ref, wk_ref, wv_ref,
                    q_ref, k_ref, v_ref, *, n_heads):
    x = x_ref[0].astype(jnp.bfloat16)                    # (ts, D)
    ts, d_model = x.shape
    hd = d_model // n_heads

    # bf16 MXU inputs, f32 accumulation.  Wq is pre-scaled by 1/sqrt(hd) on the host.
    q = jnp.dot(x, wq_ref[...], preferred_element_type=jnp.float32)
    k = jnp.dot(x, wk_ref[...], preferred_element_type=jnp.float32)
    v = jnp.dot(x, wv_ref[...], preferred_element_type=jnp.float32)

    cos = cos_ref[...]                                   # (ts, D) f32
    sin = sin_ref[...]                                   # (ts, D) f32, sign (-,+) folded per pair
    lane = jax.lax.broadcasted_iota(jnp.int32, (ts, d_model), 1)
    even = (lane % 2) == 0

    def rope(t):                                         # interleaved-pair RoPE (llama2.c style)
        swap = jnp.where(even,
                         pltpu.roll(t, d_model - 1, axis=1),   # even lanes take t[i+1]
                         pltpu.roll(t, 1, axis=1))             # odd  lanes take t[i-1]
        return t * cos + swap * sin

    qr = rope(q)
    kr = rope(k)
    for h in range(n_heads):                             # static per-head store to (B,H,C,hd)
        sl = slice(h * hd, (h + 1) * hd)
        q_ref[0, h] = qr[:, sl].astype(jnp.bfloat16)
        k_ref[0, h] = kr[:, sl].astype(jnp.bfloat16)
        v_ref[0, h] = v[:, sl].astype(jnp.bfloat16)


# ------------------ kernel 2: flash attention + fused output projection ----------------
def flash_attn_kernel(q_ref, k_ref, v_ref, wo_ref, y_ref,
                      m_scr, l_scr, acc_scr, *, n_heads, head_dim, block_q, block_k):
    qi = pl.program_id(1)
    ki = pl.program_id(2)

    @pl.when(ki == 0)
    def _init():
        m_scr[...] = jnp.full(m_scr.shape, -1e30, jnp.float32)
        l_scr[...] = jnp.zeros(l_scr.shape, jnp.float32)
        acc_scr[...] = jnp.zeros(acc_scr.shape, jnp.float32)

    def attend(masked):
        q = q_ref[0]                                     # (H, bq, hd) bf16
        k = k_ref[0]                                     # (H, bk, hd) bf16
        v = v_ref[0]                                     # (H, bk, hd) bf16
        # batched-over-heads score matmul on the MXU, f32 accumulation
        s = jnp.einsum("hqd,hkd->hqk", q, k, preferred_element_type=jnp.float32)
        if masked:                                       # only the diagonal KV tile is masked
            qpos = qi * block_q + jax.lax.broadcasted_iota(jnp.int32, s.shape, 1)
            kpos = ki * block_k + jax.lax.broadcasted_iota(jnp.int32, s.shape, 2)
            s = jnp.where(qpos >= kpos, s, -1e30)        # finite mask (safe if scores go low-prec)
        m_prev = m_scr[...]                              # (H, bq, 1) f32
        m_new = jnp.maximum(m_prev, jnp.max(s, axis=-1, keepdims=True))
        alpha = jnp.exp(m_prev - m_new)
        p = jnp.exp(s - m_new)                           # f32 exp (v5e-safe EUP path)
        l_scr[...] = alpha * l_scr[...] + jnp.sum(p, axis=-1, keepdims=True)
        acc_scr[...] = alpha * acc_scr[...] + jnp.einsum(
            "hqk,hkd->hqd", p.astype(jnp.bfloat16), v,
            preferred_element_type=jnp.float32)
        m_scr[...] = m_new

    @pl.when(ki < qi)            # fully visible KV tile: no masking work at all
    def _full():
        attend(masked=False)

    @pl.when(ki == qi)           # diagonal tile: mask, finalize, fused output projection
    def _diag():
        attend(masked=True)
        o = acc_scr[...] * pl.reciprocal(l_scr[...], approx=True)     # (H, bq, hd) f32
        o = o.astype(jnp.bfloat16)
        d_model = n_heads * head_dim
        out = jnp.zeros((block_q, d_model), jnp.float32)
        for h in range(n_heads):                         # attn_cat @ Wo^T, head by head
            out = out + jnp.dot(o[h], wo_ref[h * head_dim:(h + 1) * head_dim, :],
                                preferred_element_type=jnp.float32)
        y_ref[0] = out.astype(y_ref.dtype)
    # KV tiles with ki > qi are fully masked by causality and are skipped entirely.


# -------------------------------------- wrapper -----------------------------------------
def causal_self_attention_forward(x, freqs_cos, freqs_sin, params, *, n_heads,
                                  block_q=None, block_kv=None):
    B, C, D = x.shape
    hd = D // n_heads
    assert D % n_heads == 0 and hd % 2 == 0

    # host-side (one-time) weight prep:
    #  * (in, out) layout -> plain NN dot in-kernel
    #  * bf16 cast (MXU-native, halves weight VMEM)
    #  * flash SDPA scale 1/sqrt(head_dim) folded into Wq (RoPE is linear so it commutes)
    scale = 1.0 / math.sqrt(hd)
    wq_t = (params["wq"].T * scale).astype(jnp.bfloat16)
    wk_t = params["wk"].T.astype(jnp.bfloat16)
    wv_t = params["wv"].T.astype(jnp.bfloat16)
    wo_t = params["wo"].T.astype(jnp.bfloat16)

    # RoPE tables expanded to (C, D): cos repeated per pair lane, sin with (-,+) sign folded in.
    cos_t = jnp.repeat(jnp.tile(freqs_cos, (1, n_heads)), 2, axis=-1).astype(jnp.float32)
    sign = jnp.tile(jnp.array([-1.0, 1.0], jnp.float32), D // 2)
    sin_t = (jnp.repeat(jnp.tile(freqs_sin, (1, n_heads)), 2, axis=-1) * sign[None, :]).astype(jnp.float32)

    # tiling
    ts = C if C <= 128 else 128
    assert C % ts == 0, "sequence length must be <= 128 or a multiple of 128"
    bq = block_q or ts
    bk = block_kv or ts
    assert bq == bk and C % bq == 0, "causal block skipping assumes equal q/kv tiles"
    n_s, n_q, n_kv = C // ts, C // bq, C // bk

    # kernel 1: Q/K/V projection + RoPE -> (B, H, C, hd) bf16
    q4, k4, v4 = pl.pallas_call(
        functools.partial(qkv_rope_kernel, n_heads=n_heads),
        out_shape=(
            jax.ShapeDtypeStruct((B, n_heads, C, hd), jnp.bfloat16),
            jax.ShapeDtypeStruct((B, n_heads, C, hd), jnp.bfloat16),
            jax.ShapeDtypeStruct((B, n_heads, C, hd), jnp.bfloat16),
        ),
        grid=(B, n_s),
        in_specs=[
            pl.BlockSpec((1, ts, D), lambda b, s: (b, s, 0)),
            pl.BlockSpec((ts, D), lambda b, s: (s, 0)),
            pl.BlockSpec((ts, D), lambda b, s: (s, 0)),
            pl.BlockSpec((D, D), lambda b, s: (0, 0)),
            pl.BlockSpec((D, D), lambda b, s: (0, 0)),
            pl.BlockSpec((D, D), lambda b, s: (0, 0)),
        ],
        out_specs=(
            pl.BlockSpec((1, n_heads, ts, hd), lambda b, s: (b, 0, s, 0)),
            pl.BlockSpec((1, n_heads, ts, hd), lambda b, s: (b, 0, s, 0)),
            pl.BlockSpec((1, n_heads, ts, hd), lambda b, s: (b, 0, s, 0)),
        ),
        compiler_params=pltpu.CompilerParams(
            dimension_semantics=("parallel", "parallel"),
            vmem_limit_bytes=_VMEM_LIMIT),
    )(x, cos_t, sin_t, wq_t, wk_t, wv_t)

    # kernel 2: flash attention over KV tiles + fused output projection.
    # KV index map clamps to the diagonal so fully-masked tiles are never fetched twice.
    kv_map = lambda b, qi, ki: (b, 0, jnp.minimum(ki, qi), 0)
    y = pl.pallas_call(
        functools.partial(flash_attn_kernel, n_heads=n_heads, head_dim=hd,
                          block_q=bq, block_k=bk),
        out_shape=jax.ShapeDtypeStruct((B, C, D), x.dtype),
        grid=(B, n_q, n_kv),
        in_specs=[
            pl.BlockSpec((1, n_heads, bq, hd), lambda b, qi, ki: (b, 0, qi, 0)),
            pl.BlockSpec((1, n_heads, bk, hd), kv_map),
            pl.BlockSpec((1, n_heads, bk, hd), kv_map),
            pl.BlockSpec((D, D), lambda b, qi, ki: (0, 0)),
        ],
        out_specs=pl.BlockSpec((1, bq, D), lambda b, qi, ki: (b, qi, 0)),
        scratch_shapes=[
            pltpu.VMEM((n_heads, bq, 1), jnp.float32),   # running max
            pltpu.VMEM((n_heads, bq, 1), jnp.float32),   # running sum
            pltpu.VMEM((n_heads, bq, hd), jnp.float32),  # un-normalized output accumulator
        ],
        compiler_params=pltpu.CompilerParams(
            dimension_semantics=("parallel", "parallel", "arbitrary"),
            vmem_limit_bytes=_VMEM_LIMIT),
    )(q4, k4, v4, wo_t)
    return y


# --------------------------------- pure-JAX reference -----------------------------------
def reference_forward(x, freqs_cos, freqs_sin, p, *, n_heads):
    B, C, D = x.shape
    hd = D // n_heads
    q, k, v = x @ p["wq"].T, x @ p["wk"].T, x @ p["wv"].T

    def split(t):
        return t.reshape(B, C, n_heads, hd).transpose(0, 2, 1, 3)

    q, k, v = split(q), split(k), split(v)

    def rope(t):
        tr = t.reshape(B, n_heads, C, hd // 2, 2)
        a, b = tr[..., 0], tr[..., 1]
        cos, sin = freqs_cos[None, None], freqs_sin[None, None]
        return jnp.stack([a * cos - b * sin, a * sin + b * cos], -1).reshape(B, n_heads, C, hd)

    q, k = rope(q), rope(k)
    s = jnp.einsum("bhqd,bhkd->bhqk", q, k) / math.sqrt(hd)
    mask = jnp.tril(jnp.ones((C, C), bool))
    s = jnp.where(mask, s, -jnp.inf)
    pr = jax.nn.softmax(s, axis=-1)
    o = jnp.einsum("bhqk,bhkd->bhqd", pr, v).transpose(0, 2, 1, 3).reshape(B, C, D)
    return o @ p["wo"].T


if __name__ == "__main__":
    B, C, D, H = 2, 8, 32, 4
    hd = D // H

    key = jax.random.PRNGKey(0)
    ks = jax.random.split(key, 5)

    def init(k, shape):
        return 0.02 * jax.random.normal(k, shape, jnp.float32)

    params = dict(
        wq=init(ks[0], (D, D)),
        wk=init(ks[1], (D, D)),
        wv=init(ks[2], (D, D)),
        wo=init(ks[3], (D, D)),
    )
    x = jax.random.normal(ks[4], (B, C, D), jnp.float32)

    # llama-style rotary tables, shape (C, head_dim // 2)
    inv_freq = 1.0 / (10000.0 ** (jnp.arange(0, hd, 2, dtype=jnp.float32) / hd))
    ang = jnp.outer(jnp.arange(C, dtype=jnp.float32), inv_freq)
    freqs_cos, freqs_sin = jnp.cos(ang), jnp.sin(ang)

    y = causal_self_attention_forward(x, freqs_cos, freqs_sin, params, n_heads=H)
    y = jax.block_until_ready(y)

    y_ref = reference_forward(x, freqs_cos, freqs_sin, params, n_heads=H)
    assert y.shape == (B, C, D)
    # tolerance accounts for bf16 MXU operands + approx reciprocal (f32 accumulation throughout)
    max_err = float(jnp.max(jnp.abs(y - y_ref)))
    assert jnp.allclose(y, y_ref, rtol=2e-2, atol=2e-3), f"mismatch vs JAX reference (max err {max_err})"
    print("KERNEL_OK")
</pallas_src>

<mosaic_0001>
module attributes {stable_mosaic.version = 11 : i64} {
  func.func @qkv_rope_kernel(%arg0: i32, %arg1: i32, %arg2: memref<1x8x32xf32, #tpu.memory_space<vmem>>, %arg3: memref<8x32xf32, #tpu.memory_space<vmem>>, %arg4: memref<8x32xf32, #tpu.memory_space<vmem>>, %arg5: memref<32x32xbf16, #tpu.memory_space<vmem>>, %arg6: memref<32x32xbf16, #tpu.memory_space<vmem>>, %arg7: memref<32x32xbf16, #tpu.memory_space<vmem>>, %arg8: memref<1x4x8x8xbf16, #tpu.memory_space<vmem>>, %arg9: memref<1x4x8x8xbf16, #tpu.memory_space<vmem>>, %arg10: memref<1x4x8x8xbf16, #tpu.memory_space<vmem>>) attributes {dimension_semantics = [#tpu.dimension_semantics<parallel>, #tpu.dimension_semantics<parallel>], iteration_bounds = array<i64: 2, 1>, scalar_prefetch = 0 : i64, scratch_operands = 0 : i64, tpu.core_type = #tpu.core_type<tc>, window_params = [{transform_indices = @transform_0, window_bounds = array<i64: 1, 8, 32>}, {transform_indices = @transform_1, window_bounds = array<i64: 8, 32>}, {transform_indices = @transform_2, window_bounds = array<i64: 8, 32>}, {pipeline_mode = #tpu.pipeline_mode<synchronous>, transform_indices = @transform_3, window_bounds = array<i64: 32, 32>}, {pipeline_mode = #tpu.pipeline_mode<synchronous>, transform_indices = @transform_4, window_bounds = array<i64: 32, 32>}, {pipeline_mode = #tpu.pipeline_mode<synchronous>, transform_indices = @transform_5, window_bounds = array<i64: 32, 32>}, {transform_indices = @transform_6, window_bounds = array<i64: 1, 4, 8, 8>}, {transform_indices = @transform_7, window_bounds = array<i64: 1, 4, 8, 8>}, {transform_indices = @transform_8, window_bounds = array<i64: 1, 4, 8, 8>}]} {
    %c0 = arith.constant 0 : index
    %c0_0 = arith.constant 0 : index
    %c0_1 = arith.constant 0 : index
    %0 = vector.load %arg2[%c0, %c0_0, %c0_1] : memref<1x8x32xf32, #tpu.memory_space<vmem>>, vector<1x8x32xf32>
    %1 = vector.shape_cast %0 : vector<1x8x32xf32> to vector<8x32xf32>
    %2 = arith.truncf %1 : vector<8x32xf32> to vector<8x32xbf16>
    %c0_2 = arith.constant 0 : index
    %c0_3 = arith.constant 0 : index
    %3 = vector.load %arg5[%c0_2, %c0_3] : memref<32x32xbf16, #tpu.memory_space<vmem>>, vector<32x32xbf16>
    %cst = arith.constant dense<0.000000e+00> : vector<8x32xf32>
    %4 = tpu.matmul %2, %3, %cst {dimension_numbers = #tpu.dot_dimension_numbers<[1], [0], [0], [1], [0, 0, 1, 1], [], []>} : vector<8x32xbf16>, vector<32x32xbf16>, vector<8x32xf32> -> vector<8x32xf32>
    %c0_4 = arith.constant 0 : index
    %c0_5 = arith.constant 0 : index
    %5 = vector.load %arg6[%c0_4, %c0_5] : memref<32x32xbf16, #tpu.memory_space<vmem>>, vector<32x32xbf16>
    %cst_6 = arith.constant dense<0.000000e+00> : vector<8x32xf32>
    %6 = tpu.matmul %2, %5, %cst_6 {dimension_numbers = #tpu.dot_dimension_numbers<[1], [0], [0], [1], [0, 0, 1, 1], [], []>} : vector<8x32xbf16>, vector<32x32xbf16>, vector<8x32xf32> -> vector<8x32xf32>
    %c0_7 = arith.constant 0 : index
    %c0_8 = arith.constant 0 : index
    %7 = vector.load %arg7[%c0_7, %c0_8] : memref<32x32xbf16, #tpu.memory_space<vmem>>, vector<32x32xbf16>
    %cst_9 = arith.constant dense<0.000000e+00> : vector<8x32xf32>
    %8 = tpu.matmul %2, %7, %cst_9 {dimension_numbers = #tpu.dot_dimension_numbers<[1], [0], [0], [1], [0, 0, 1, 1], [], []>} : vector<8x32xbf16>, vector<32x32xbf16>, vector<8x32xf32> -> vector<8x32xf32>
    %c0_10 = arith.constant 0 : index
    %c0_11 = arith.constant 0 : index
    %9 = vector.load %arg3[%c0_10, %c0_11] : memref<8x32xf32, #tpu.memory_space<vmem>>, vector<8x32xf32>
    %c0_12 = arith.constant 0 : index
    %c0_13 = arith.constant 0 : index
    %10 = vector.load %arg4[%c0_12, %c0_13] : memref<8x32xf32, #tpu.memory_space<vmem>>, vector<8x32xf32>
    %11 = tpu.iota {dimensions = array<i32: 1>} : vector<8x32xi32>
    %c2_i32 = arith.constant 2 : i32
    %c0_i32 = arith.constant 0 : i32
    %12 = arith.cmpi eq, %c2_i32, %c0_i32 : i32
    %c1_i32 = arith.constant 1 : i32
    %13 = arith.select %12, %c1_i32, %c2_i32 : i32
    %14 = vector.broadcast %13 : i32 to vector<8x32xi32>
    %15 = arith.remsi %11, %14 : vector<8x32xi32>
    %c0_i32_14 = arith.constant 0 : i32
    %16 = vector.broadcast %c0_i32_14 : i32 to vector<8x32xi32>
    %17 = arith.cmpi ne, %15, %16 : vector<8x32xi32>
    %c0_i32_15 = arith.constant 0 : i32
    %18 = vector.broadcast %c0_i32_15 : i32 to vector<8x32xi32>
    %19 = arith.cmpi slt, %15, %18 : vector<8x32xi32>
    %c0_i32_16 = arith.constant 0 : i32
    %20 = arith.cmpi slt, %13, %c0_i32_16 : i32
    %21 = vector.broadcast %20 : i1 to vector<8x32xi1>
    %22 = vector.broadcast %21 : vector<8x32xi1> to vector<8x32xi1>
    %23 = arith.xori %19, %22 : vector<8x32xi1>
    %24 = arith.andi %23, %17 : vector<8x32xi1>
    %25 = vector.broadcast %13 : i32 to vector<8x32xi32>
    %26 = arith.addi %15, %25 : vector<8x32xi32>
    %27 = arith.select %24, %26, %15 : vector<8x32xi1>, vector<8x32xi32>
    %c0_i32_17 = arith.constant 0 : i32
    %28 = vector.broadcast %c0_i32_17 : i32 to vector<8x32xi32>
    %29 = arith.cmpi eq, %27, %28 : vector<8x32xi32>
    %c31_i32 = arith.constant 31 : i32
    %30 = tpu.dynamic_rotate %4 by %c31_i32 dim 1 : vector<8x32xf32>, i32 -> vector<8x32xf32>
    %c1_i32_18 = arith.constant 1 : i32
    %31 = tpu.dynamic_rotate %4 by %c1_i32_18 dim 1 : vector<8x32xf32>, i32 -> vector<8x32xf32>
    %32 = arith.select %29, %30, %31 : vector<8x32xi1>, vector<8x32xf32>
    %33 = arith.mulf %4, %9 : vector<8x32xf32>
    %34 = arith.mulf %32, %10 : vector<8x32xf32>
    %35 = arith.addf %33, %34 : vector<8x32xf32>
    %c31_i32_19 = arith.constant 31 : i32
    %36 = tpu.dynamic_rotate %6 by %c31_i32_19 dim 1 : vector<8x32xf32>, i32 -> vector<8x32xf32>
    %c1_i32_20 = arith.constant 1 : i32
    %37 = tpu.dynamic_rotate %6 by %c1_i32_20 dim 1 : vector<8x32xf32>, i32 -> vector<8x32xf32>
    %38 = arith.select %29, %36, %37 : vector<8x32xi1>, vector<8x32xf32>
    %39 = arith.mulf %6, %9 : vector<8x32xf32>
    %40 = arith.mulf %38, %10 : vector<8x32xf32>
    %41 = arith.addf %39, %40 : vector<8x32xf32>
    %42 = vector.extract_strided_slice %35 {offsets = [0, 0], sizes = [8, 8], strides = [1, 1]} : vector<8x32xf32> to vector<8x8xf32>
    %43 = arith.truncf %42 : vector<8x8xf32> to vector<8x8xbf16>
    %c0_21 = arith.constant 0 : index
    %c0_22 = arith.constant 0 : index
    %c0_23 = arith.constant 0 : index
    %c0_24 = arith.constant 0 : index
    %44 = vector.load %arg8[%c0_21, %c0_22, %c0_23, %c0_24] : memref<1x4x8x8xbf16, #tpu.memory_space<vmem>>, vector<1x1x8x8xbf16>
    %45 = vector.shape_cast %44 : vector<1x1x8x8xbf16> to vector<8x8xbf16>
    %46 = vector.shape_cast %43 : vector<8x8xbf16> to vector<1x1x8x8xbf16>
    tpu.vector_store %arg8[%c0_21, %c0_22, %c0_23, %c0_24], %46 {strides = array<i32>} : memref<1x4x8x8xbf16, #tpu.memory_space<vmem>>, vector<1x1x8x8xbf16>,
    %47 = vector.extract_strided_slice %41 {offsets = [0, 0], sizes = [8, 8], strides = [1, 1]} : vector<8x32xf32> to vector<8x8xf32>
    %48 = arith.truncf %47 : vector<8x8xf32> to vector<8x8xbf16>
    %c0_25 = arith.constant 0 : index
    %c0_26 = arith.constant 0 : index
    %c0_27 = arith.constant 0 : index
    %c0_28 = arith.constant 0 : index
    %49 = vector.load %arg9[%c0_25, %c0_26, %c0_27, %c0_28] : memref<1x4x8x8xbf16, #tpu.memory_space<vmem>>, vector<1x1x8x8xbf16>
    %50 = vector.shape_cast %49 : vector<1x1x8x8xbf16> to vector<8x8xbf16>
    %51 = vector.shape_cast %48 : vector<8x8xbf16> to vector<1x1x8x8xbf16>
    tpu.vector_store %arg9[%c0_25, %c0_26, %c0_27, %c0_28], %51 {strides = array<i32>} : memref<1x4x8x8xbf16, #tpu.memory_space<vmem>>, vector<1x1x8x8xbf16>,
    %52 = vector.extract_strided_slice %8 {offsets = [0, 0], sizes = [8, 8], strides = [1, 1]} : vector<8x32xf32> to vector<8x8xf32>
    %53 = arith.truncf %52 : vector<8x8xf32> to vector<8x8xbf16>
    %c0_29 = arith.constant 0 : index
    %c0_30 = arith.constant 0 : index
    %c0_31 = arith.constant 0 : index
    %c0_32 = arith.constant 0 : index
    %54 = vector.load %arg10[%c0_29, %c0_30, %c0_31, %c0_32] : memref<1x4x8x8xbf16, #tpu.memory_space<vmem>>, vector<1x1x8x8xbf16>
    %55 = vector.shape_cast %54 : vector<1x1x8x8xbf16> to vector<8x8xbf16>
    %56 = vector.shape_cast %53 : vector<8x8xbf16> to vector<1x1x8x8xbf16>
    tpu.vector_store %arg10[%c0_29, %c0_30, %c0_31, %c0_32], %56 {strides = array<i32>} : memref<1x4x8x8xbf16, #tpu.memory_space<vmem>>, vector<1x1x8x8xbf16>,
    %57 = vector.extract_strided_slice %35 {offsets = [0, 8], sizes = [8, 8], strides = [1, 1]} : vector<8x32xf32> to vector<8x8xf32>
    %58 = arith.truncf %57 : vector<8x8xf32> to vector<8x8xbf16>
    %c0_33 = arith.constant 0 : index
    %c1 = arith.constant 1 : index
    %c0_34 = arith.constant 0 : index
    %c0_35 = arith.constant 0 : index
    %59 = vector.load %arg8[%c0_33, %c1, %c0_34, %c0_35] : memref<1x4x8x8xbf16, #tpu.memory_space<vmem>>, vector<1x1x8x8xbf16>
    %60 = vector.shape_cast %59 : vector<1x1x8x8xbf16> to vector<8x8xbf16>
    %61 = vector.shape_cast %58 : vector<8x8xbf16> to vector<1x1x8x8xbf16>
    tpu.vector_store %arg8[%c0_33, %c1, %c0_34, %c0_35], %61 {strides = array<i32>} : memref<1x4x8x8xbf16, #tpu.memory_space<vmem>>, vector<1x1x8x8xbf16>,
    %62 = vector.extract_strided_slice %41 {offsets = [0, 8], sizes = [8, 8], strides = [1, 1]} : vector<8x32xf32> to vector<8x8xf32>
    %63 = arith.truncf %62 : vector<8x8xf32> to vector<8x8xbf16>
    %c0_36 = arith.constant 0 : index
    %c1_37 = arith.constant 1 : index
    %c0_38 = arith.constant 0 : index
    %c0_39 = arith.constant 0 : index
    %64 = vector.load %arg9[%c0_36, %c1_37, %c0_38, %c0_39] : memref<1x4x8x8xbf16, #tpu.memory_space<vmem>>, vector<1x1x8x8xbf16>
    %65 = vector.shape_cast %64 : vector<1x1x8x8xbf16> to vector<8x8xbf16>
    %66 = vector.shape_cast %63 : vector<8x8xbf16> to vector<1x1x8x8xbf16>
    tpu.vector_store %arg9[%c0_36, %c1_37, %c0_38, %c0_39], %66 {strides = array<i32>} : memref<1x4x8x8xbf16, #tpu.memory_space<vmem>>, vector<1x1x8x8xbf16>,
    %67 = vector.extract_strided_slice %8 {offsets = [0, 8], sizes = [8, 8], strides = [1, 1]} : vector<8x32xf32> to vector<8x8xf32>
    %68 = arith.truncf %67 : vector<8x8xf32> to vector<8x8xbf16>
    %c0_40 = arith.constant 0 : index
    %c1_41 = arith.constant 1 : index
    %c0_42 = arith.constant 0 : index
    %c0_43 = arith.constant 0 : index
    %69 = vector.load %arg10[%c0_40, %c1_41, %c0_42, %c0_43] : memref<1x4x8x8xbf16, #tpu.memory_space<vmem>>, vector<1x1x8x8xbf16>
    %70 = vector.shape_cast %69 : vector<1x1x8x8xbf16> to vector<8x8xbf16>
    %71 = vector.shape_cast %68 : vector<8x8xbf16> to vector<1x1x8x8xbf16>
    tpu.vector_store %arg10[%c0_40, %c1_41, %c0_42, %c0_43], %71 {strides = array<i32>} : memref<1x4x8x8xbf16, #tpu.memory_space<vmem>>, vector<1x1x8x8xbf16>,
    %72 = vector.extract_strided_slice %35 {offsets = [0, 16], sizes = [8, 8], strides = [1, 1]} : vector<8x32xf32> to vector<8x8xf32>
    %73 = arith.truncf %72 : vector<8x8xf32> to vector<8x8xbf16>
    %c0_44 = arith.constant 0 : index
    %c2 = arith.constant 2 : index
    %c0_45 = arith.constant 0 : index
    %c0_46 = arith.constant 0 : index
    %74 = vector.load %arg8[%c0_44, %c2, %c0_45, %c0_46] : memref<1x4x8x8xbf16, #tpu.memory_space<vmem>>, vector<1x1x8x8xbf16>
    %75 = vector.shape_cast %74 : vector<1x1x8x8xbf16> to vector<8x8xbf16>
    %76 = vector.shape_cast %73 : vector<8x8xbf16> to vector<1x1x8x8xbf16>
    tpu.vector_store %arg8[%c0_44, %c2, %c0_45, %c0_46], %76 {strides = array<i32>} : memref<1x4x8x8xbf16, #tpu.memory_space<vmem>>, vector<1x1x8x8xbf16>,
    %77 = vector.extract_strided_slice %41 {offsets = [0, 16], sizes = [8, 8], strides = [1, 1]} : vector<8x32xf32> to vector<8x8xf32>
    %78 = arith.truncf %77 : vector<8x8xf32> to vector<8x8xbf16>
    %c0_47 = arith.constant 0 : index
    %c2_48 = arith.constant 2 : index
    %c0_49 = arith.constant 0 : index
    %c0_50 = arith.constant 0 : index
    %79 = vector.load %arg9[%c0_47, %c2_48, %c0_49, %c0_50] : memref<1x4x8x8xbf16, #tpu.memory_space<vmem>>, vector<1x1x8x8xbf16>
    %80 = vector.shape_cast %79 : vector<1x1x8x8xbf16> to vector<8x8xbf16>
    %81 = vector.shape_cast %78 : vector<8x8xbf16> to vector<1x1x8x8xbf16>
    tpu.vector_store %arg9[%c0_47, %c2_48, %c0_49, %c0_50], %81 {strides = array<i32>} : memref<1x4x8x8xbf16, #tpu.memory_space<vmem>>, vector<1x1x8x8xbf16>,
    %82 = vector.extract_strided_slice %8 {offsets = [0, 16], sizes = [8, 8], strides = [1, 1]} : vector<8x32xf32> to vector<8x8xf32>
    %83 = arith.truncf %82 : vector<8x8xf32> to vector<8x8xbf16>
    %c0_51 = arith.constant 0 : index
    %c2_52 = arith.constant 2 : index
    %c0_53 = arith.constant 0 : index
    %c0_54 = arith.constant 0 : index
    %84 = vector.load %arg10[%c0_51, %c2_52, %c0_53, %c0_54] : memref<1x4x8x8xbf16, #tpu.memory_space<vmem>>, vector<1x1x8x8xbf16>
    %85 = vector.shape_cast %84 : vector<1x1x8x8xbf16> to vector<8x8xbf16>
    %86 = vector.shape_cast %83 : vector<8x8xbf16> to vector<1x1x8x8xbf16>
    tpu.vector_store %arg10[%c0_51, %c2_52, %c0_53, %c0_54], %86 {strides = array<i32>} : memref<1x4x8x8xbf16, #tpu.memory_space<vmem>>, vector<1x1x8x8xbf16>,
    %87 = vector.extract_strided_slice %35 {offsets = [0, 24], sizes = [8, 8], strides = [1, 1]} : vector<8x32xf32> to vector<8x8xf32>
    %88 = arith.truncf %87 : vector<8x8xf32> to vector<8x8xbf16>
    %c0_55 = arith.constant 0 : index
    %c3 = arith.constant 3 : index
    %c0_56 = arith.constant 0 : index
    %c0_57 = arith.constant 0 : index
    %89 = vector.load %arg8[%c0_55, %c3, %c0_56, %c0_57] : memref<1x4x8x8xbf16, #tpu.memory_space<vmem>>, vector<1x1x8x8xbf16>
    %90 = vector.shape_cast %89 : vector<1x1x8x8xbf16> to vector<8x8xbf16>
    %91 = vector.shape_cast %88 : vector<8x8xbf16> to vector<1x1x8x8xbf16>
    tpu.vector_store %arg8[%c0_55, %c3, %c0_56, %c0_57], %91 {strides = array<i32>} : memref<1x4x8x8xbf16, #tpu.memory_space<vmem>>, vector<1x1x8x8xbf16>,
    %92 = vector.extract_strided_slice %41 {offsets = [0, 24], sizes = [8, 8], strides = [1, 1]} : vector<8x32xf32> to vector<8x8xf32>
    %93 = arith.truncf %92 : vector<8x8xf32> to vector<8x8xbf16>
    %c0_58 = arith.constant 0 : index
    %c3_59 = arith.constant 3 : index
    %c0_60 = arith.constant 0 : index
    %c0_61 = arith.constant 0 : index
    %94 = vector.load %arg9[%c0_58, %c3_59, %c0_60, %c0_61] : memref<1x4x8x8xbf16, #tpu.memory_space<vmem>>, vector<1x1x8x8xbf16>
    %95 = vector.shape_cast %94 : vector<1x1x8x8xbf16> to vector<8x8xbf16>
    %96 = vector.shape_cast %93 : vector<8x8xbf16> to vector<1x1x8x8xbf16>
    tpu.vector_store %arg9[%c0_58, %c3_59, %c0_60, %c0_61], %96 {strides = array<i32>} : memref<1x4x8x8xbf16, #tpu.memory_space<vmem>>, vector<1x1x8x8xbf16>,
    %97 = vector.extract_strided_slice %8 {offsets = [0, 24], sizes = [8, 8], strides = [1, 1]} : vector<8x32xf32> to vector<8x8xf32>
    %98 = arith.truncf %97 : vector<8x8xf32> to vector<8x8xbf16>
    %c0_62 = arith.constant 0 : index
    %c3_63 = arith.constant 3 : index
    %c0_64 = arith.constant 0 : index
    %c0_65 = arith.constant 0 : index
    %99 = vector.load %arg10[%c0_62, %c3_63, %c0_64, %c0_65] : memref<1x4x8x8xbf16, #tpu.memory_space<vmem>>, vector<1x1x8x8xbf16>
    %100 = vector.shape_cast %99 : vector<1x1x8x8xbf16> to vector<8x8xbf16>
    %101 = vector.shape_cast %98 : vector<8x8xbf16> to vector<1x1x8x8xbf16>
    tpu.vector_store %arg10[%c0_62, %c3_63, %c0_64, %c0_65], %101 {strides = array<i32>} : memref<1x4x8x8xbf16, #tpu.memory_space<vmem>>, vector<1x1x8x8xbf16>,
    return
  }
  func.func @transform_0(%arg0: i32, %arg1: i32) -> (i32, i32, i32) {
    %c0_i32 = arith.constant 0 : i32
    %c0_i32_0 = arith.constant 0 : i32
    return %arg0, %arg1, %c0_i32 : i32, i32, i32
  }
  func.func @transform_1(%arg0: i32, %arg1: i32) -> (i32, i32) {
    %c0_i32 = arith.constant 0 : i32
    %c0_i32_0 = arith.constant 0 : i32
    return %arg1, %c0_i32 : i32, i32
  }
  func.func @transform_2(%arg0: i32, %arg1: i32) -> (i32, i32) {
    %c0_i32 = arith.constant 0 : i32
    %c0_i32_0 = arith.constant 0 : i32
    return %arg1, %c0_i32 : i32, i32
  }
  func.func @transform_3(%arg0: i32, %arg1: i32) -> (i32, i32) {
    %c0_i32 = arith.constant 0 : i32
    %c0_i32_0 = arith.constant 0 : i32
    %c0_i32_1 = arith.constant 0 : i32
    return %c0_i32, %c0_i32_0 : i32, i32
  }
  func.func @transform_4(%arg0: i32, %arg1: i32) -> (i32, i32) {
    %c0_i32 = arith.constant 0 : i32
    %c0_i32_0 = arith.constant 0 : i32
    %c0_i32_1 = arith.constant 0 : i32
    return %c0_i32, %c0_i32_0 : i32, i32
  }
  func.func @transform_5(%arg0: i32, %arg1: i32) -> (i32, i32) {
    %c0_i32 = arith.constant 0 : i32
    %c0_i32_0 = arith.constant 0 : i32
    %c0_i32_1 = arith.constant 0 : i32
    return %c0_i32, %c0_i32_0 : i32, i32
  }
  func.func @transform_6(%arg0: i32, %arg1: i32) -> (i32, i32, i32, i32) {
    %c0_i32 = arith.constant 0 : i32
    %c0_i32_0 = arith.constant 0 : i32
    %c0_i32_1 = arith.constant 0 : i32
    return %arg0, %c0_i32, %arg1, %c0_i32_0 : i32, i32, i32, i32
  }
  func.func @transform_7(%arg0: i32, %arg1: i32) -> (i32, i32, i32, i32) {
    %c0_i32 = arith.constant 0 : i32
    %c0_i32_0 = arith.constant 0 : i32
    %c0_i32_1 = arith.constant 0 : i32
    return %arg0, %c0_i32, %arg1, %c0_i32_0 : i32, i32, i32, i32
  }
  func.func @transform_8(%arg0: i32, %arg1: i32) -> (i32, i32, i32, i32) {
    %c0_i32 = arith.constant 0 : i32
    %c0_i32_0 = arith.constant 0 : i32
    %c0_i32_1 = arith.constant 0 : i32
    return %arg0, %c0_i32, %arg1, %c0_i32_0 : i32, i32, i32, i32
  }
}

</mosaic_0001>

<bundles_post_ra>
// kernel: tpu_custom_call.1
= control target key start
LH: loop header
LB: loop body
LE: loop exit
PB: predicated region body
PF: predicated region fallthrough
CT: control target
= control target key end

     0   :  { %s1948_s0 = inlined_call_operand.hbm [shape: f32[2,8,32], index: 0, kind: input, shape index: {}]   ;;  %s1949_s1 = inlined_call_operand.hbm [shape: f32[8,32], index: 1, kind: input, shape index: {}]   ;;  %s1950_s2 = inlined_call_operand.hbm [shape: f32[8,32], index: 2, kind: input, shape index: {}]   ;;  %s1951_s3 = inlined_call_operand.hbm [shape: bf16[32,32], index: 3, kind: input, shape index: {}]   ;;  %s1952_s4 = inlined_call_operand.hbm [shape: bf16[32,32], index: 4, kind: input, shape index: {}]   ;;  %s1953_s5 = inlined_call_operand.hbm [shape: bf16[32,32], index: 5, kind: input, shape index: {}]   ;;  %s1954_s6 = inlined_call_operand.hbm [shape: bf16[2,4,8,8], index: 6, kind: output, shape index: {0}]   ;;  %s1955_s7 = inlined_call_operand.hbm [shape: bf16[2,4,8,8], index: 7, kind: output, shape index: {1}]   ;;  %s1956_s8 = inlined_call_operand.hbm [shape: bf16[2,4,8,8], index: 8, kind: output, shape index: {2}]  }
   0x1   :  { %1960 = sst [smem:[#allocation23_spill]] %s1949_s1 }
   0x2   :  { %1961 = sst [smem:[#allocation24_spill]] %s1950_s2 }
   0x3   :  { %1962 = sst [smem:[#allocation25_spill]] %s1951_s3 }
   0x4   :  { %1963 = sst [smem:[#allocation26_spill]] %s1952_s4 }
   0x5   :  { %1964 = sst [smem:[#allocation27_spill]] %s1953_s5 }
   0x6   :  { %14 = vsyncpa [#allocation3], 0 }
   0x7   :  { %16 = vsyncpa [#allocation3 + $0x1], 0 }
   0x8   :  { %17 = vsyncpa [#allocation6], 0 }
   0x9   :  { %18 = vsyncpa [#allocation9], 0 }
   0xa   :  { %19 = vsyncpa [#allocation12], 0 }
   0xb   :  { %20 = vsyncpa [#allocation4], 0 }
   0xc   :  { %22 = vsyncpa [#allocation4 + $0x1], 0 }
   0xd   :  { %23 = vsyncpa [#allocation15], 0 }
   0xe   :  { %25 = vsyncpa [#allocation15 + $0x1], 0  ;;  %s1598_s27 = smov 0   ;;  %s1600_s28 = smov 0  }
   0xf   :  { %s1602_s29 = smov 0   ;;  %s1604_s30 = smov 0  }
  0x10   :  { %s1606_s9 = smov 0   ;;  %s1608_s10 = smov 0  }
  0x11 LB: > { %s1629_s11 = sadd.s32 4294967295, %s1530_s10   ;;  %p993_p0 = scmp.ge.s32.totalorder %s1530_s10, 1  ;;  %s1530_s10 = sphi %s1608_s10, %s31_s10   ;;  %s1526_s9 = sphi %s1606_s9, %s1992_s9   ;;  %s1522_s30 = sphi %s1604_s30, %s1991_s30   ;;  %s1518_s29 = sphi %s1602_s29, %s1990_s29   ;;  %s1514_s28 = sphi %s1600_s28, %s1989_s28   ;;  %s1510_s27 = sphi %s1598_s27, %s1988_s27  }
  0x12   : > { %p1957_p1 = scmp.eq.s32.totalorder %s1629_s11, 0  ;;  %p275_p2 = scmp.lt.s32.totalorder %s1530_s10, 3 }
  0x13   : > { %s1532_s13 = smov [#allocation5]   ;;  %s1533_s15 = smov [#allocation8]  }
  0x14   : > { %p1634_p3 = pnand %p993_p0, %p275_p2  ;;  %s290_s14 = sshll.u32 %s1532_s13, 4  ;;  %s291_s14 = int_to_ptr.vmem [resolvable:$true] %s290_s14 }
  0x15   : > { %s313_s16 = sshll.u32 %s1533_s15, 4  ;;  %s1534_s18 = smov [#allocation7]   ;;  %s314_s16 = int_to_ptr.vmem [resolvable:$true] %s313_s16 }
  0x16   : > { %s1965_s12 = scalar_select %p1634_p3, 1, 0 }
  0x17   : > { %p1111_p5 = pneg %p1634_p3  ;;  %s303_s19 = sshll.u32 %s1534_s18, 4  ;;  %s304_s19 = int_to_ptr.vmem [resolvable:$true] %s303_s19 }
  0x18   : > { %s1235_s21 = scalar_lea.vmem %s291_s14, 128  ;;  %p1243_p11 = scmp.lt.s32.totalorder %s291_s14, %s291_s14 }
  0x19   : > { %p1643_p6 = pnand %p1111_p5, %p1957_p1  ;;  %p1236_p8 = scmp.ne.s32.totalorder %s291_s14, %s1235_s21 }
  0x1a   : > { %p1244_p12 = scmp.lt.s32.totalorder %s1235_s21, %s1235_s21 }
  0x1b   : > { %p1649_p7 = pneg %p1643_p6 }
  0x1c   : > { %p1245_p13 = por %p1244_p12, %p1243_p11 }
  0x1d   : > { %p1238_p9 = pnand %p1236_p8, %p1649_p7 }
  0x1f   : > { %p1239_p10 = pneg %p1238_p9 }
  0x21   : > { %p1246_p0 = pnand %p1245_p13, %p1239_p10 }
  0x23   : > { %1249 = shalt.err (!%p1246_p0)
}
  0x24   : > { %s1968_s1 = sld [smem:[#allocation23_spill]]  ;;  %s1261_s24 = scalar_lea.vmem %s314_s16, 256 }
  0x25   : > { %p1262_p2 = scmp.ne.s32.totalorder %s314_s16, %s1261_s24  ;;  %p1269_p1 = scmp.lt.s32.totalorder %s314_s16, %s314_s16 }
  0x26   : > { %p1270_p8 = scmp.lt.s32.totalorder %s1261_s24, %s1261_s24 }
  0x27   : > { %p1264_p5 = pnand %p1262_p2, %p1649_p7 }
  0x28   : > { %p1271_p9 = por %p1270_p8, %p1269_p1 }
  0x29   : > { %p1265_p4 = pneg %p1264_p5 }
  0x2a   : > { %1114 = dma.hbm_to_vmem [thread:$0]  (!%p1643_p6), %s1968_s1, 128, %s291_s14, [#allocation6]  }
  0x2b   : > { %p1272_p3 = pnand %p1271_p9, %p1265_p4 }
  0x2d   : > { %1275 = shalt.err (!%p1272_p3)
}
  0x2e   : > { %s1535_s25 = smov 64   ;;  %s1536_s26 = smov 4  }
  0x2f   : > { %s1969_s3 = sld [smem:[#allocation25_spill]]  ;;  %s1287_s15 = scalar_lea.vmem %s304_s19, 128 }
  0x30   : > { %p1288_p10 = scmp.ne.s32.totalorder %s304_s19, %s1287_s15  ;;  %p1295_p4 = scmp.lt.s32.totalorder %s304_s19, %s304_s19 }
  0x31   : > { %p1296_p3 = scmp.lt.s32.totalorder %s1287_s15, %s1287_s15 }
  0x32   : > { %p1290_p11 = pnand %p1288_p10, %p1649_p7 }
  0x33   : > { %p1297_p12 = por %p1296_p3, %p1295_p4 }
  0x34   : > { %p1291_p1 = pneg %p1290_p11 }
  0x35   : > { %1120 = dma.hbm_to_vmem [thread:$0]  (!%p1643_p6), %s1969_s3, 256, %s314_s16, [#allocation9], %s1535_s25, %s1535_s25, %s1536_s26  }
  0x36   : > { %p1298_p13 = pnand %p1297_p12, %p1291_p1 }
  0x38   : > { %1301 = shalt.err (!%p1298_p13)
}
  0x39   : > { %s1970_s2 = sld [smem:[#allocation24_spill]]  ;;  %s1537_s22 = smov [#allocation10]  }
  0x3a   : > { %s326_s16 = sshll.u32 %s1537_s22, 4  ;;  %s1538_s23 = smov [#allocation11]   ;;  %s327_s16 = int_to_ptr.vmem [resolvable:$true] %s326_s16 }
  0x3b   : > { %s339_s24 = sshll.u32 %s1538_s23, 4  ;;  %s1313_s13 = scalar_lea.vmem %s327_s16, 256  ;;  %s340_s24 = int_to_ptr.vmem [resolvable:$true] %s339_s24 }
  0x3c   : > { %p1314_p0 = scmp.ne.s32.totalorder %s327_s16, %s1313_s13  ;;  %p1321_p8 = scmp.lt.s32.totalorder %s327_s16, %s327_s16 }
  0x3d   : > { %p1322_p9 = scmp.lt.s32.totalorder %s1313_s13, %s1313_s13 }
  0x3e   : > { %p1316_p2 = pnand %p1314_p0, %p1649_p7 }
  0x3f   : > { %1117 = dma.hbm_to_vmem [thread:$0]  (!%p1643_p6), %s1970_s2, 128, %s304_s19, [#allocation6]  }
  0x40   : > { %p1317_p5 = pneg %p1316_p2  ;;  %p1323_p10 = por %p1322_p9, %p1321_p8 }
  0x42   : > { %p1324_p11 = pnand %p1323_p10, %p1317_p5 }
  0x44   : > { %1327 = shalt.err (!%p1324_p11)
}
  0x45   : > { %s1971_s4 = sld [smem:[#allocation26_spill]]  ;;  %s1339_s15 = scalar_lea.vmem %s340_s24, 256 }
  0x46   : > { %p1340_p1 = scmp.ne.s32.totalorder %s340_s24, %s1339_s15  ;;  %p1347_p12 = scmp.lt.s32.totalorder %s340_s24, %s340_s24 }
  0x47   : > { %p1348_p13 = scmp.lt.s32.totalorder %s1339_s15, %s1339_s15 }
  0x48   : > { %p1342_p4 = pnand %p1340_p1, %p1649_p7 }
  0x49   : > { %p1349_p0 = por %p1348_p13, %p1347_p12 }
  0x4a   : > { %p1343_p3 = pneg %p1342_p4 }
  0x4b   : > { %1123 = dma.hbm_to_vmem [thread:$0]  (!%p1643_p6), %s1971_s4, 256, %s327_s16, [#allocation9], %s1535_s25, %s1535_s25, %s1536_s26  }
  0x4c   : > { %p1350_p2 = pnand %p1349_p0, %p1343_p3 }
  0x4e   : > { %1353 = shalt.err (!%p1350_p2)
}
  0x4f   : > { %s1972_s5 = sld [smem:[#allocation27_spill]]  ;;  %s1959_s17 = sadd.s32 4294967294, %s1530_s10  }
  0x50   : > { %s43_s20 = sadd.s32 1, %s1526_s9  ;;  %s52_s22 = sadd.s32 1, %s1518_s29 }
  0x51   : > { %p45_p7 = scmp.ge.s32.totalorder %s43_s20, 2  ;;  %p59_p5 = scmp.ne.s32.totalorder %s1518_s29, %s1514_s28 }
  0x52   : > { %p60_p8 = scmp.eq.s32.totalorder %s1530_s10, 0  ;;  %p65_p9 = scmp.ne.s32.totalorder %s1514_s28, %s1510_s27 }
  0x53   : > { %s1994_s20 = smov (%p45_p7, %s43_s20), 0  ;;  %p1974_p11 = scmp.eq.s32.totalorder %s1629_s11, 0 }
  0x54   : > { %p1707_p10 = por %p60_p8, %p59_p5  ;;  %p206_p1 = scmp.eq.s32.totalorder %s1629_s11, 1 }
  0x55   : > { %1126 = dma.hbm_to_vmem [thread:$0]  (!%p1643_p6), %s1972_s5, 256, %s340_s24, [#allocation12], %s1535_s25, %s1535_s25, %s1536_s26  }
  0x56   : > { %p1713_p6 = por %p1974_p11, %p65_p9  ;;  %s47_s26 = ssub.s32 %s1526_s9, %s1994_s20 }
  0x57   : > { %p50_p4 = scmp.eq.s32.totalorder %s47_s26, 0  ;;  %p212_p3 = scmp.eq.s32.totalorder %s1959_s17, 1 }
  0x58   : > { %p1722_p12 = por %p206_p1, %p59_p5  ;;  %p1146_p13 = scmp.lt.s32.totalorder %s1530_s10, 2 }
  0x59   : > { %s1728_s24 = scalar_select %p50_p4, %s1518_s29, %s52_s22  }
  0x5a   : > { %p1730_p0 = por %p212_p3, %p65_p9  ;;  %s353_s19 = sand.u32 1, %s1518_s29  }
  0x5b   : > { %s1000_s14 = sshll.u32 %s353_s19, 3  ;;  %s1001_s15 = sshll.u32 %s1526_s9, 7 }
  0x5c   : > { %s363_s26 = scalar_lea.hbm %s1948_s0, %s1001_s15  ;;  %s357_s1 = scalar_lea.vmem [#allocation2], %s1000_s14 }
  0x5d   : > { %s365_s17 = sshll.u32 %s357_s1, 4  ;;  %p1741_p2 = pnand %p1146_p13, %p1707_p10  ;;  %s366_s17 = int_to_ptr.vmem [resolvable:$true] %s365_s17 }
  0x5e   : > { %s354_s22 = scalar_lea.sflag [#allocation3], %s353_s19  ;;  %s1367_s3 = scalar_lea.vmem %s366_s17, 128 }
  0x5f   : > { %p1356_p7 = pneg %p1741_p2  ;;  %p1368_p5 = scmp.ne.s32.totalorder %s366_s17, %s1367_s3 }
  0x60   : > { %s1539_s4 = smov [#allocation2]  }
  0x61   : > { %p1370_p8 = pnand %p1368_p5, %p1356_p7  ;;  %s1372_s5 = sshll.u32 %s1539_s4, 4  ;;  %s1373_s5 = int_to_ptr.vmem [resolvable:$false] %s1372_s5 }
  0x62   : > { %s1374_s15 = scalar_lea.vmem %s1373_s5, 256  ;;  %p1375_p11 = scmp.lt.s32.totalorder %s366_s17, %s1373_s5 }
  0x63   : > { %p1371_p9 = pneg %p1370_p8  ;;  %p1376_p1 = scmp.lt.s32.totalorder %s1374_s15, %s1367_s3 }
  0x65   : > { %p1377_p4 = por %p1376_p1, %p1375_p11 }
  0x67   : > { %p1378_p3 = pnand %p1377_p4, %p1371_p9 }
  0x69   : > { %1381 = shalt.err (!%p1378_p3)
}
  0x6a   : > { %1130 = dma.hbm_to_vmem [thread:$0]  (!%p1741_p2), %s363_s26, 128, %s366_s17, %s354_s22  }
  0x6b   : > { %p1979_p10 = scmp.ne.s32.totalorder %s1965_s12, 0 }
  0x6c   : > { %s1752_s1 = sand.u32 (!%p1979_p10), 1, %s1514_s28  }
  0x6d   : > { %374 = sbr.rel (%p1979_p10) target bundleno = 859 (0x35b), region = 44  ;;  %s1003_s4 = sshll.u32 (!%p1979_p10), %s1752_s1, 3 }
  0x6e   : > { %s377_s16 = scalar_lea.sflag (!%p1979_p10), [#allocation3], %s1752_s1  ;;  %s380_s19 = scalar_lea.vmem (!%p1979_p10), [#allocation2], %s1003_s4 }
  0x72   : > { %1485 = dma.done.wait (%p1713_p6), %s377_s16, 128  }
  0x73   : > { %1487 = vsyncadd (%p1713_p6), %s377_s16, 4294967168  ;;  %p1980_p13 = scmp.eq.s32.totalorder %s1629_s11, 0 }
  0x75   : > { %1489 = dma.done.wait (%p1980_p13), [#allocation6], 256   ;;  %p1981_p2 = pmov %p1980_p13 }
  0x77   : > { %1491 = vsyncadd (%p1981_p2), [#allocation6], 4294967040  ;;  %p1982_p7 = pmov %p1981_p2 }
  0x78   : > { %p1983_p5 = pmov %p1981_p2 }
  0x79   : > { %1493 = dma.done.wait (%p1982_p7), [#allocation9], 512  }
  0x7a   : > { %1495 = vsyncadd (%p1983_p5), [#allocation9], 4294966784  ;;  %p1984_p8 = pmov %p1981_p2 }
  0x7b   : > { %p1985_p9 = pmov %p1981_p2 }
  0x7c   : > { %1497 = dma.done.wait (%p1984_p8), [#allocation12], 256  }
  0x7d   : > { %1499 = vsyncadd (%p1985_p9), [#allocation12], 4294967040  ;;  %v1540_v0 = vmov 0.0   ;;  %vm1541_vm0 = vmmov 0   ;;  %v1218_v1 = vld [vmem:[#allocation8 + $0x8] sm:$0xff]   ;;  %v1219_v2 = vld [vmem:[#allocation10 + $0x8] sm:$0xff]   ;;  %v620_v30 = vlaneseq }
  0x7e   : > { %1059 = vmatprep.subr.bf16.mxu0 %v1540_v0  ;;  %1067 = vmatprep.subr.bf16.mxu1 %v1540_v0  ;;  %v1220_v3 = vld [vmem:[#allocation8] sm:$0xff]   ;;  %v1221_v4 = vld [vmem:[#allocation10] sm:$0xff]   ;;  %vm462_vm1 = vcmask 261120   ;;  %v1222_v7 = vld [vmem:[#allocation11 + $0x8] sm:$0xff]   ;;  %s1542_s2 = smov 32   ;;  %vm635_vm2 = vcmask 1047808  }
  0x7f   : > { %1063 = vmatprep.mubr.msk.bf16.mxu0 %vm1541_vm0, %v1540_v0  ;;  %1071 = vmatprep.mubr.msk.bf16.mxu1 %vm1541_vm0, %v1540_v0  ;;  %v444_v5 = vld [vmem:[%s380_s19] sm:$0xff]  ;;  %s1781_s3 = sshll.u32 %s1752_s1, 4  ;;  %vm671_vm3 = vcmask 60416   ;;  %s1543_s12 = smov 127   ;;  %v621_v31 = vand.u32 127, %v620_v30  ;;  %v618_v33 = vld [vmem:[#allocation5] sm:$0xff] }
  0x80   : > { %1060 = vmatpush3.bf16.msra.mxu0 %v1218_v1  ;;  %1068 = vmatpush3.bf16.msra.mxu1 %v1219_v2  ;;  %v445_v6 = vpack.c.bf16 %v444_v5, %v444_v5  ;;  %v1223_v8 = vld [vmem:[#allocation11] sm:$0xff]   ;;  %s1784_s5 = scalar_lea.vmem [#allocation16], %s1781_s3  ;;  %s1544_s17 = smov 97   ;;  %v619_v34 = vld [vmem:[#allocation7] sm:$0xff] }
  0x81   : > { %1061 = vmatprep.subr.bf16.mxu0 %v1540_v0  ;;  %1069 = vmatprep.subr.bf16.mxu1 %v1540_v0  ;;  %s1545_s25 = smov 120   ;;  %s1546_s14 = smov 112   ;;  %v626_v32 = vand.u32 1, %v621_v31 }
  0x82   : > { %s435_s18 = scalar_lea.vmem [#allocation14], %s1781_s3  ;;  %s1547_s21 = smov 104  }
  0x83   : > { %vm634_vm4 = vcmp.eq.s32.totalorder %v626_v32, 0  ;;  %s1797_s26 = scalar_lea.vmem [#allocation13], %s1781_s3  ;;  %s773_s22 = sshll.u32 %s435_s18, 4  ;;  %s1808_s22 = int_to_ptr.vmem [resolvable:$true] %s773_s22 }
  0x84   : > { %1062 = vmatpush3.bf16.msra.mxu0 %v1220_v3  ;;  %1070 = vmatpush3.bf16.msra.mxu1 %v1221_v4  ;;  %s736_s15 = sand.u32 1, %s1629_s11   ;;  %s1806_s4 = sshll.u32 %s1522_s30, 8 }
  0x85   : > { %1075 = vmatprep.subr.bf16.mxu0 %v1540_v0  ;;  %s790_s11 = sshll.u32 %s1784_s5, 4  ;;  %s756_s30 = sshll.u32 %s1797_s26, 4  ;;  %s1851_s11 = int_to_ptr.vmem [resolvable:$true] %s790_s11  ;;  %s1861_s30 = int_to_ptr.vmem [resolvable:$true] %s756_s30 }
  0x86   : > { %s1823_s3 = scalar_lea.sflag [#allocation15], %s736_s15 }
  0x87   : > { %1064 = vmatmul.mubr.msk.bf16.vlgmr.msra.gmra.mxu0 %vm462_vm1, %v445_v6  ;;  %1072 = vmatmul.mubr.msk.bf16.vlgmr.msra.gmra.mxu1 %vm462_vm1, %v445_v6 }
  0x88   : > { %1079 = vmatprep.mubr.msk.bf16.mxu0 %vm1541_vm0, %v1540_v0  ;;  %1076 = vmatpush3.bf16.msra.mxu0 %v1222_v7 }
  0x89   : > { %1077 = vmatprep.subr.bf16.mxu0 %v1540_v0 }
  0x8c   : > { %1078 = vmatpush3.bf16.msra.mxu0 %v1223_v8 }
  0x8f   : > { %1080 = vmatmul.mubr.msk.bf16.vlgmr.msra.gmra.mxu0 %vm462_vm1, %v445_v6 }
 0x147   : > { %v500_v9 = vpop.f32.mrf.mxu0  ;;  %v556_v10 = vpop.f32.mrf.mxu1 }
 0x148   : > { %653 = vrot.lane.b32.xlu0 %v556_v10, %s1542_s2  ;;  %v667_v38 = vmul.f32 %v618_v33, %v556_v10  ;;  %v650_v44 = vmul.f32 %v618_v33, %v500_v9 }
 0x149   : > { %v1065_v11 = vpop.f32.mrf.mxu0  ;;  %v1073_v12 = vpop.f32.mrf.mxu1 }
 0x14b   : > { %v503_v13 = vpop.f32.mrf.mxu0  ;;  %v559_v14 = vpop.f32.mrf.mxu1 }
 0x14c   : > { %636 = vrot.lane.b32.xlu0 %v500_v9, %s1542_s2 }
 0x14d   : > { %v1066_v15 = vpop.f32.mrf.mxu0  ;;  %v1074_v16 = vpop.f32.mrf.mxu1 }
 0x14f   : > { %v612_v21 = vpop.f32.mrf.mxu0 }
 0x150   : > { %v675_v22 = vpack.c.bf16 %v612_v21, %v612_v21 }
 0x151   : > { %v1081_v23 = vpop.f32.mrf.mxu0 }
 0x152   : > { %676 = vst.msk [vmem:[%s1784_s5] sm:$0xf] %vm671_vm3, %v675_v22 }
 0x153   : > { %v615_v24 = vpop.f32.mrf.mxu0 }
 0x155   : > { %v1082_v25 = vpop.f32.mrf.mxu0 }
 0x1ba   : > { %v654_v17 = vpop.permute.xlu0 %653 }
 0x1bb   : > { %v655_v18 = vsel %vm635_vm2, %v654_v17, %v556_v10 }
 0x1bc   : > { %656 = vrot.lane.b32.xlu1 %v655_v18, %s1542_s2 }
 0x1be   : > { %v637_v19 = vpop.permute.xlu0 %636 }
 0x1bf   : > { %v638_v20 = vsel %vm635_vm2, %v637_v19, %v500_v9 }
 0x1c0   : > { %639 = vrot.lane.b32.xlu1 %v638_v20, %s1542_s2  ;;  %s1816_s2 = scalar_lea.hbm %s1955_s7, %s1806_s4 }
 0x22e   : > { %v657_v26 = vpop.permute.xlu1 %656 }
 0x22f   : > { %v658_v27 = vsel %vm635_vm2, %v657_v26, %v556_v10 }
 0x230   : > { %660 = vrot.lane.b32.xlu0 %v658_v27, %s1543_s12  ;;  %663 = vrot.lane.b32.xlu1 %v658_v27, %s1544_s17 }
 0x232   : > { %v640_v28 = vpop.permute.xlu1 %639 }
 0x233   : > { %v641_v29 = vsel %vm635_vm2, %v640_v28, %v500_v9 }
 0x234   : > { %646 = vrot.lane.b32.xlu1 %v641_v29, %s1544_s17  ;;  %643 = vrot.lane.b32.xlu0 %v641_v29, %s1543_s12  ;;  %s1382_s12 = scalar_lea.vmem %s1808_s22, 256  ;;  %s1548_s17 = smov [#allocation14]  }
 0x235   : > { %p1383_p6 = scmp.ne.s32.totalorder %s1808_s22, %s1382_s12 }
 0x237   : > { %p1384_p11 = pnand %p1383_p6, %p1722_p12 }
 0x238   : > { %696 = vrot.lane.b32.xlu0 %v675_v22, %s1545_s25 }
 0x239   : > { %p1385_p1 = pneg %p1384_p11 }
 0x23c   : > { %711 = vrot.lane.b32.xlu0 %v675_v22, %s1546_s14 }
 0x2a2   : > { %v664_v35 = vpop.permute.xlu1 %663  ;;  %v661_v36 = vpop.permute.xlu0 %660 }
 0x2a3   : > { %v666_v37 = vsel %vm634_vm4, %v661_v36, %v664_v35 }
 0x2a4   : > { %v668_v39 = vmul.f32 %v666_v37, %v619_v34 }
 0x2a6   : > { %v669_v40 = vadd.f32 %v668_v39, %v667_v38  ;;  %v647_v41 = vpop.permute.xlu1 %646  ;;  %v644_v42 = vpop.permute.xlu0 %643 }
 0x2a7   : > { %v649_v43 = vsel %vm634_vm4, %v644_v42, %v647_v41 }
 0x2a8   : > { %v673_v45 = vpack.c.bf16 %v669_v40, %v669_v40  ;;  %v651_v46 = vmul.f32 %v649_v43, %v619_v34 }
 0x2aa   : > { %v652_v47 = vadd.f32 %v651_v46, %v650_v44  ;;  %706 = vrot.lane.b32.xlu1 %v673_v45, %s1546_s14  ;;  %688 = vrot.lane.b32.xlu0 %v673_v45, %s1545_s25  ;;  %v697_v48 = vpop.permute.xlu0 %696  ;;  %674 = vst.msk [vmem:[%s435_s18] sm:$0xf] %vm671_vm3, %v673_v45 }
 0x2ab   : > { %1026 = vst.msk [vmem:[%s1784_s5 + $0x4] sm:$0xf] %vm671_vm3, %v697_v48 }
 0x2ac   : > { %v670_v49 = vpack.c.bf16 %v652_v47, %v652_v47 }
 0x2ae   : > { %680 = vrot.lane.b32.xlu1 %v670_v49, %s1545_s25  ;;  %721 = vrot.lane.b32.xlu0 %v673_v45, %s1547_s21  ;;  %v712_v50 = vpop.permute.xlu0 %711  ;;  %672 = vst.msk [vmem:[%s1797_s26] sm:$0xf] %vm671_vm3, %v670_v49  ;;  %s1386_s25 = sshll.u32 %s1548_s17, 4  ;;  %s1387_s25 = int_to_ptr.vmem [resolvable:$false] %s1386_s25 }
 0x2af   : > { %1029 = vst.msk [vmem:[%s1784_s5 + $0x8] sm:$0xf] %vm671_vm3, %v712_v50  ;;  %p1389_p4 = scmp.lt.s32.totalorder %s1808_s22, %s1387_s25 }
 0x2b2   : > { %701 = vrot.lane.b32.xlu1 %v670_v49, %s1546_s14  ;;  %726 = vrot.lane.b32.xlu0 %v675_v22, %s1547_s21  ;;  %s1388_s14 = scalar_lea.vmem %s1387_s25, 512 }
 0x2b3   : > { %p1390_p3 = scmp.lt.s32.totalorder %s1388_s14, %s1382_s12 }
 0x2b5   : > { %p1391_p10 = por %p1390_p3, %p1389_p4 }
 0x2b6   : > { %716 = vrot.lane.b32.xlu1 %v670_v49, %s1547_s21 }
 0x2b7   : > { %p1392_p13 = pnand %p1391_p10, %p1385_p1 }
 0x31c   : > { %v707_v51 = vpop.permute.xlu1 %706  ;;  %v689_v52 = vpop.permute.xlu0 %688 }
 0x31d   : > { %1028 = vst.msk [vmem:[%s435_s18 + $0x8] sm:$0xf] %vm671_vm3, %v707_v51  ;;  %1024 = vst.msk [vmem:[%s435_s18 + $0x4] sm:$0xf] %vm671_vm3, %v689_v52 }
 0x320   : > { %v681_v53 = vpop.permute.xlu1 %680  ;;  %v722_v54 = vpop.permute.xlu0 %721 }
 0x321   : > { %1022 = vst.msk [vmem:[%s1797_s26 + $0x4] sm:$0xf] %vm671_vm3, %v681_v53  ;;  %1031 = vst.msk [vmem:[%s435_s18 + $0xc] sm:$0xf] %vm671_vm3, %v722_v54 }
 0x322   : > { %1395 = shalt.err (!%p1392_p13)
}
 0x323   : > { %s1396_s18 = scalar_lea.hbm %s1816_s2, 256  ;;  %s1400_s16 = scalar_lea.hbm %s1955_s7, 512 }
 0x324   : > { %p1397_p2 = scmp.ne.s32.totalorder %s1816_s2, %s1396_s18  ;;  %p1401_p8 = scmp.lt.s32.totalorder %s1816_s2, %s1955_s7 }
 0x325   : > { %p1402_p9 = scmp.lt.s32.totalorder %s1400_s16, %s1396_s18 }
 0x326   : > { %p1398_p7 = pnand %p1397_p2, %p1722_p12 }
 0x327   : > { %p1403_p6 = por %p1402_p9, %p1401_p8 }
 0x328   : > { %p1399_p5 = pneg %p1398_p7 }
 0x32a   : > { %p1404_p11 = pnand %p1403_p6, %p1399_p5 }
 0x32c   : > { %1407 = shalt.err (!%p1404_p11)
}
 0x32d   : > { %s1549_s12 = smov 64   ;;  %s1550_s25 = smov 4   ;;  %v702_v55 = vpop.permute.xlu1 %701  ;;  %v727_v56 = vpop.permute.xlu0 %726 }
 0x32e   : > { %1106 = dma.vmem_to_hbm [thread:$0]  (%p1722_p12), %s1808_s22, 256, %s1816_s2, %s1823_s3, %s1549_s12, %s1549_s12, %s1550_s25  }
 0x32f   : > { %s1857_s21 = scalar_lea.hbm %s1956_s8, %s1806_s4  ;;  %1027 = vst.msk [vmem:[%s1797_s26 + $0x8] sm:$0xf] %vm671_vm3, %v702_v55  ;;  %1032 = vst.msk [vmem:[%s1784_s5 + $0xc] sm:$0xf] %vm671_vm3, %v727_v56  ;;  %s1408_s22 = scalar_lea.vmem %s1851_s11, 256 }
 0x330   : > { %p1409_p1 = scmp.ne.s32.totalorder %s1851_s11, %s1408_s22  ;;  %s1551_s2 = smov [#allocation16]  }
 0x331   : > { %s1412_s15 = sshll.u32 %s1551_s2, 4  ;;  %s1413_s15 = int_to_ptr.vmem [resolvable:$false] %s1412_s15 }
 0x332   : > { %p1410_p4 = pnand %p1409_p1, %p1722_p12  ;;  %s1414_s16 = scalar_lea.vmem %s1413_s15, 512 }
 0x333   : > { %p1415_p10 = scmp.lt.s32.totalorder %s1851_s11, %s1413_s15  ;;  %p1416_p13 = scmp.lt.s32.totalorder %s1414_s16, %s1408_s22 }
 0x334   : > { %p1411_p3 = pneg %p1410_p4 }
 0x335   : > { %p1417_p2 = por %p1416_p13, %p1415_p10 }
 0x337   : > { %p1418_p7 = pnand %p1417_p2, %p1411_p3 }
 0x339   : > { %1421 = shalt.err (!%p1418_p7)
}
 0x33a   : > { %s1422_s19 = scalar_lea.hbm %s1857_s21, 256  ;;  %s1426_s14 = scalar_lea.hbm %s1956_s8, 512 }
 0x33b   : > { %p1423_p5 = scmp.ne.s32.totalorder %s1857_s21, %s1422_s19  ;;  %p1427_p6 = scmp.lt.s32.totalorder %s1857_s21, %s1956_s8 }
 0x33c   : > { %p1428_p11 = scmp.lt.s32.totalorder %s1426_s14, %s1422_s19 }
 0x33d   : > { %p1424_p8 = pnand %p1423_p5, %p1722_p12 }
 0x33e   : > { %p1429_p1 = por %p1428_p11, %p1427_p6 }
 0x33f   : > { %p1425_p9 = pneg %p1424_p8 }
 0x341   : > { %p1430_p4 = pnand %p1429_p1, %p1425_p9 }
 0x343   : > { %1433 = shalt.err (!%p1430_p4)
}
 0x344   : > { %1107 = dma.vmem_to_hbm [thread:$0]  (%p1722_p12), %s1851_s11, 256, %s1857_s21, %s1823_s3, %s1549_s12, %s1549_s12, %s1550_s25   ;;  %v717_v57 = vpop.permute.xlu1 %716 }
 0x345   : > { %s1895_s16 = scalar_lea.hbm %s1954_s6, %s1806_s4  ;;  %1030 = vst.msk [vmem:[%s1797_s26 + $0xc] sm:$0xf] %vm671_vm3, %v717_v57  ;;  %s732_s19 = scalar_lea.sflag [#allocation4], %s1752_s1 }
 0x346   : > { %s1434_s5 = scalar_lea.vmem %s1861_s30, 256  ;;  %s1552_s17 = smov [#allocation13]  }
 0x347   : > { %p1435_p3 = scmp.ne.s32.totalorder %s1861_s30, %s1434_s5  ;;  %s1438_s14 = sshll.u32 %s1552_s17, 4  ;;  %s1439_s14 = int_to_ptr.vmem [resolvable:$false] %s1438_s14 }
 0x348   : > { %s1440_s18 = scalar_lea.vmem %s1439_s14, 512  ;;  %p1441_p2 = scmp.lt.s32.totalorder %s1861_s30, %s1439_s14 }
 0x349   : > { %p1436_p10 = pnand %p1435_p3, %p1722_p12  ;;  %p1442_p7 = scmp.lt.s32.totalorder %s1440_s18, %s1434_s5 }
 0x34b   : > { %p1437_p13 = pneg %p1436_p10  ;;  %p1443_p5 = por %p1442_p7, %p1441_p2 }
 0x34d   : > { %p1444_p8 = pnand %p1443_p5, %p1437_p13 }
 0x34f   : > { %1447 = shalt.err (!%p1444_p8)
}
 0x350   : > { %s1448_s26 = scalar_lea.hbm %s1895_s16, 256  ;;  %s1452_s11 = scalar_lea.hbm %s1954_s6, 512 }
 0x351   : > { %p1449_p9 = scmp.ne.s32.totalorder %s1895_s16, %s1448_s26  ;;  %p1453_p1 = scmp.lt.s32.totalorder %s1895_s16, %s1954_s6 }
 0x352   : > { %p1454_p4 = scmp.lt.s32.totalorder %s1452_s11, %s1448_s26 }
 0x353   : > { %p1450_p6 = pnand %p1449_p9, %p1722_p12 }
 0x354   : > { %p1455_p3 = por %p1454_p4, %p1453_p1 }
 0x355   : > { %p1451_p11 = pneg %p1450_p6 }
 0x357   : > { %p1456_p10 = pnand %p1455_p3, %p1451_p11 }
 0x359   : > { %1459 = shalt.err (!%p1456_p10)
}
 0x35a   : > { %1105 = dma.vmem_to_hbm [thread:$0]  (%p1722_p12), %s1861_s30, 256, %s1895_s16, %s732_s19, %s1549_s12, %s1549_s12, %s1550_s25  }
 0x35b PF: > { %s805_s2 = sand.u32 1, %s1510_s27   ;;  %p1986_p13 = scmp.ge.s32.totalorder %s1530_s10, 2 }
 0x35c   : > { %s806_s22 = scalar_lea.sflag [#allocation4], %s805_s2 }
 0x35d   : > { %p1132_p2 = pnand %p1986_p13, %p1730_p0 }
 0x35f   : > { %p1133_p7 = pneg %p1132_p2 }
 0x361   : > { %1501 = dma.done.wait (%p1133_p7), %s806_s22, 256  }
 0x362   : > { %1503 = vsyncadd (%p1133_p7), %s806_s22, 4294967040  ;;  %s1987_s23 = sadd.s32 4294967294, %s1530_s10  }
 0x363   : > { %s814_s15 = sand.u32 1, %s1987_s23  }
 0x364   : > { %s815_s5 = scalar_lea.sflag [#allocation15], %s814_s15 }
 0x365   : > { %1505 = dma.done.wait (%p1133_p7), %s815_s5, 512  }
 0x366   : > { %1507 = vsyncadd (%p1133_p7), %s815_s5, 4294966784  ;;  %s31_s10 = sadd.s32 1, %s1530_s10   ;;  %s1988_s27 = smov %s1514_s28 }
 0x367   : > { %p28_p12 = scmp.ge.s32.totalorder %s31_s10, 4   ;;  %s1989_s28 = smov %s1518_s29 }
 0x368   : > { %s1990_s29 = smov %s1728_s24  ;;  %s1991_s30 = smov %s1526_s9 }
 0x369   : > { %s1992_s9 = smov %s1994_s20  ;;  %30 = sbr.rel (!%p28_p12) target bundleno = 17 (0x11), region = 152 }
 0x36e   :  { %829 = vsyncpa [#allocation3], 1 }
 0x36f   :  { %831 = vsyncpa [#allocation3 + $0x1], 1 }
 0x370   :  { %832 = vsyncpa [#allocation6], 1 }
 0x371   :  { %833 = vsyncpa [#allocation9], 1 }
 0x372   :  { %834 = vsyncpa [#allocation12], 1 }
 0x373   :  { %835 = vsyncpa [#allocation4], 1 }
 0x374   :  { %837 = vsyncpa [#allocation4 + $0x1], 1 }
 0x375   :  { %838 = vsyncpa [#allocation15], 1 }
 0x376   :  { %840 = vsyncpa [#allocation15 + $0x1], 1 }

</bundles_post_ra>
